<compile_context>
chip_gen: v7x
topology: tpu7x:2x2x1
jax: 0.10.0
libtpu: 0.0.40
codegen_flags: <defaults>
</compile_context>

<pallas_src>
import functools

import jax
import jax.numpy as jnp
from jax.experimental import pallas as pl
from jax.experimental.pallas import tpu as pltpu

_LANE = 128
_TARGET_BLOCK_BYTES = 2 << 20  # ~2 MiB per input block


def _round_up(x, m):
    return ((x + m - 1) // m) * m


def _round_down(x, m):
    return (x // m) * m


def _elementwise_bce(x_ref, z_ref):
    x = x_ref[...].astype(jnp.float32)
    z = z_ref[...].astype(jnp.float32)
    # Numerically stable BCE-with-logits (same formulation torch uses):
    #   l = max(x, 0) - x*z + log1p(exp(-|x|))
    # log(1 + t) instead of log1p(t): abs error <= ~1.2e-7 (negligible for a
    # loss) and keeps the per-element EUP cost to one exp + one log on v5e.
    t = jnp.exp(-jnp.abs(x))
    return jnp.maximum(x, 0.0) - x * z + jnp.log(1.0 + t)


def _mask_tail_rows(lm, valid_rows, block_rows):
    # Zero out rows of the (grid-edge) partial block that lie past the end of
    # the real array: their input values are unspecified garbage.  Compiled
    # out entirely when block_rows divides valid_rows.
    if valid_rows % block_rows == 0:
        return lm
    i = pl.program_id(0)
    row = jax.lax.broadcasted_iota(jnp.int32, lm.shape, 0)
    return jnp.where(row + i * block_rows < valid_rows, lm, 0.0)


def _bce_kernel(x_ref, z_ref, loss_m_ref, psum_ref, *, valid_rows, block_rows):
    lm = _elementwise_bce(x_ref, z_ref)
    # Out-of-bounds rows of a partial edge block are dropped on writeback.
    loss_m_ref[...] = lm.astype(loss_m_ref.dtype)
    lm = _mask_tail_rows(lm, valid_rows, block_rows)
    # Sublane-only partial reduce; the tiny cross-tile / cross-lane finish is
    # done in the wrapper (no cross-grid-step carry -> axis stays "parallel").
    psum_ref[...] = jnp.sum(lm, axis=0, keepdims=True)


def _bce_sum_kernel(x_ref, z_ref, psum_ref, *, valid_rows, block_rows):
    lm = _mask_tail_rows(_elementwise_bce(x_ref, z_ref), valid_rows, block_rows)
    psum_ref[...] = jnp.sum(lm, axis=0, keepdims=True)


def _pick_block_rows(total_rows, row_bytes, block_rows=None):
    """Choose a sublane tile size (multiple of 8, or the full extent)."""
    if block_rows is not None:
        t = max(8, _round_down(int(block_rows), 8))
        return total_rows if t >= total_rows else t
    if total_rows < 16:
        return total_rows  # single full-extent block (any size is legal)
    # ~2 MiB per input block, rounded down to a multiple of 8.
    t = max(8, _round_down(_TARGET_BLOCK_BYTES // max(row_bytes, 1), 8))
    # v7x megacore: keep >= 2 grid steps so both TensorCores get work.
    t = min(t, _round_up(pl.cdiv(total_rows, 2), 8))
    return t


def bce_loss(logits_list, targets, size_sum=True, block_rows=None,
             compute_elementwise=True):
    """Pallas forward of BCELoss (flag=True, epoch=0, sample_weight=None)."""
    logits = logits_list[0]
    assert logits.shape == targets.shape and logits.ndim == 2
    B, C = logits.shape
    n = B * C
    out_dtype = logits.dtype

    # Layout: use a lane-dense (rows, 128) *view* when it is a pure row-major
    # reshape (bitcast, no HBM repack) of (B, C); otherwise stream the native
    # (B, C) layout directly.  No padding in either case.
    if n % _LANE == 0:
        R, L = n // _LANE, _LANE
        x2d = logits.reshape(R, L)
        z2d = targets.reshape(R, L)
        lane_dense = True
    else:
        R, L = B, C
        x2d, z2d = logits, targets
        lane_dense = False

    in_itemsize = jnp.dtype(logits.dtype).itemsize
    tr = _pick_block_rows(R, L * in_itemsize, block_rows)
    num_tiles = pl.cdiv(R, tr)

    row_spec = pl.BlockSpec((tr, L), lambda i: (i, 0))
    psum_spec = pl.BlockSpec((1, L), lambda i: (i, 0))
    psum_shape = jax.ShapeDtypeStruct((num_tiles, L), jnp.float32)
    kern_kwargs = dict(valid_rows=R, block_rows=tr)

    bytes_accessed = 2 * n * in_itemsize + num_tiles * L * 4
    if compute_elementwise:
        bytes_accessed += n * jnp.dtype(out_dtype).itemsize
    cost = pl.CostEstimate(flops=5 * n, transcendentals=2 * n,
                           bytes_accessed=bytes_accessed)
    cparams = pltpu.CompilerParams(dimension_semantics=("parallel",))

    if compute_elementwise:
        loss_m_2d, psums = pl.pallas_call(
            functools.partial(_bce_kernel, **kern_kwargs),
            grid=(num_tiles,),
            in_specs=[row_spec, row_spec],
            out_specs=(row_spec, psum_spec),
            out_shape=(jax.ShapeDtypeStruct((R, L), out_dtype), psum_shape),
            compiler_params=cparams,
            cost_estimate=cost,
        )(x2d, z2d)
        loss_m = loss_m_2d.reshape(B, C) if lane_dense else loss_m_2d
    else:
        psums = pl.pallas_call(
            functools.partial(_bce_sum_kernel, **kern_kwargs),
            grid=(num_tiles,),
            in_specs=[row_spec, row_spec],
            out_specs=psum_spec,
            out_shape=psum_shape,
            compiler_params=cparams,
            cost_estimate=cost,
        )(x2d, z2d)
        loss_m = None

    total = jnp.sum(psums)  # tiny (num_tiles, L) f32 reduce in JAX
    # size_sum=True  ->  loss_m.sum(1).mean()  ==  sum(loss_m) / B
    loss = total / B if size_sum else total
    # TODO(synk): epoch != 0 pos/neg loss-mean re-weighting not implemented.
    return ([loss], [loss_m] if compute_elementwise else [])


def _torch_like_reference(logits, targets):
    x = logits.astype(jnp.float32)
    z = targets.astype(jnp.float32)
    lm = jnp.maximum(x, 0.0) - x * z + jnp.log1p(jnp.exp(-jnp.abs(x)))
    return lm, lm.sum(axis=1).mean(), lm.sum()


if __name__ == "__main__":
    key = jax.random.PRNGKey(0)
    k1, k2, k3, k4, k5, k6 = jax.random.split(key, 6)

    # Case 1: small shape consistent with the module (batch=8, attributes=32).
    # n % 128 == 0 -> lane-dense view, single block.
    B, C = 8, 32
    logits = jax.random.normal(k1, (B, C), dtype=jnp.float32)
    targets = (jax.random.uniform(k2, (B, C)) > 0.5).astype(jnp.float32)

    loss_list, loss_m_list = bce_loss([logits], targets)
    loss = jax.block_until_ready(loss_list[0])
    loss_m = jax.block_until_ready(loss_m_list[0])
    ref_lm, ref_mean, ref_sum = _torch_like_reference(logits, targets)
    assert loss_m.shape == (B, C)
    assert jnp.allclose(loss_m, ref_lm, atol=1e-5, rtol=1e-5)
    assert jnp.allclose(loss, ref_mean, atol=1e-4, rtol=1e-5)

    # size_sum=False path.
    loss_s_list, _ = bce_loss([logits], targets, size_sum=False)
    assert jnp.allclose(jax.block_until_ready(loss_s_list[0]), ref_sum,
                        atol=1e-4, rtol=1e-5)

    # Sum-only fast path (skips the loss_m writeback).
    loss_f_list, _ = bce_loss([logits], targets, compute_elementwise=False)
    assert jnp.allclose(jax.block_until_ready(loss_f_list[0]), ref_mean,
                        atol=1e-4, rtol=1e-5)

    # Case 2: lane-dense path with a multi-tile grid and a ragged last tile
    # (48*32/128 = 12 rows, block_rows=8 -> 2 tiles, last tile masked).
    B2, C2 = 48, 32
    logits2 = jax.random.normal(k3, (B2, C2), dtype=jnp.float32)
    targets2 = (jax.random.uniform(k4, (B2, C2)) > 0.5).astype(jnp.float32)
    loss2_list, loss2_m_list = bce_loss([logits2], targets2, block_rows=8)
    loss2 = jax.block_until_ready(loss2_list[0])
    loss2_m = jax.block_until_ready(loss2_m_list[0])
    ref_lm2, ref_mean2, _ = _torch_like_reference(logits2, targets2)
    assert jnp.allclose(loss2_m, ref_lm2, atol=1e-5, rtol=1e-5)
    assert jnp.allclose(loss2, ref_mean2, atol=1e-4, rtol=1e-5)

    # Case 3: native (B, C) layout (n % 128 != 0), multi-tile + masked tail.
    B3, C3 = 20, 40
    logits3 = jax.random.normal(k5, (B3, C3), dtype=jnp.float32)
    targets3 = (jax.random.uniform(k6, (B3, C3)) > 0.5).astype(jnp.float32)
    loss3_list, loss3_m_list = bce_loss([logits3], targets3, block_rows=8)
    loss3 = jax.block_until_ready(loss3_list[0])
    loss3_m = jax.block_until_ready(loss3_m_list[0])
    ref_lm3, ref_mean3, ref_sum3 = _torch_like_reference(logits3, targets3)
    assert jnp.allclose(loss3_m, ref_lm3, atol=1e-5, rtol=1e-5)
    assert jnp.allclose(loss3, ref_mean3, atol=1e-4, rtol=1e-5)
    loss3s_list, _ = bce_loss([logits3], targets3, size_sum=False, block_rows=8)
    assert jnp.allclose(jax.block_until_ready(loss3s_list[0]), ref_sum3,
                        atol=1e-4, rtol=1e-5)

    print("KERNEL_OK")
</pallas_src>

<mosaic_0001>
module attributes {stable_mosaic.version = 11 : i64} {
  func.func @_bce_kernel(%arg0: i32, %arg1: memref<2x128xf32, #tpu.memory_space<vmem>>, %arg2: memref<2x128xf32, #tpu.memory_space<vmem>>, %arg3: memref<2x128xf32, #tpu.memory_space<vmem>>, %arg4: memref<1x128xf32, #tpu.memory_space<vmem>>) attributes {dimension_semantics = [#tpu.dimension_semantics<parallel>], iteration_bounds = array<i64: 1>, scalar_prefetch = 0 : i64, scratch_operands = 0 : i64, tpu.core_type = #tpu.core_type<tc>, window_params = [{transform_indices = @transform_0, window_bounds = array<i64: 2, 128>}, {transform_indices = @transform_1, window_bounds = array<i64: 2, 128>}, {transform_indices = @transform_2, window_bounds = array<i64: 2, 128>}, {transform_indices = @transform_3, window_bounds = array<i64: 1, 128>}]} {
    %c0 = arith.constant 0 : index
    %c0_0 = arith.constant 0 : index
    %0 = vector.load %arg1[%c0, %c0_0] : memref<2x128xf32, #tpu.memory_space<vmem>>, vector<2x128xf32>
    %c0_1 = arith.constant 0 : index
    %c0_2 = arith.constant 0 : index
    %1 = vector.load %arg2[%c0_1, %c0_2] : memref<2x128xf32, #tpu.memory_space<vmem>>, vector<2x128xf32>
    %2 = math.absf %0 : vector<2x128xf32>
    %cst = arith.constant 0.000000e+00 : f32
    %3 = vector.broadcast %cst : f32 to vector<2x128xf32>
    %4 = arith.subf %3, %2 : vector<2x128xf32>
    %5 = math.exp %4 : vector<2x128xf32>
    %cst_3 = arith.constant 0.000000e+00 : f32
    %6 = vector.broadcast %cst_3 : f32 to vector<2x128xf32>
    %7 = arith.maximumf %0, %6 : vector<2x128xf32>
    %8 = arith.mulf %0, %1 : vector<2x128xf32>
    %9 = arith.subf %7, %8 : vector<2x128xf32>
    %cst_4 = arith.constant 1.000000e+00 : f32
    %10 = vector.broadcast %cst_4 : f32 to vector<2x128xf32>
    %11 = arith.addf %10, %5 : vector<2x128xf32>
    %12 = math.log %11 : vector<2x128xf32>
    %13 = arith.addf %9, %12 : vector<2x128xf32>
    %c0_5 = arith.constant 0 : index
    %c0_6 = arith.constant 0 : index
    %14 = vector.load %arg3[%c0_5, %c0_6] : memref<2x128xf32, #tpu.memory_space<vmem>>, vector<2x128xf32>
    tpu.vector_store %arg3[%c0_5, %c0_6], %13 {strides = array<i32>} : memref<2x128xf32, #tpu.memory_space<vmem>>, vector<2x128xf32>,
    %cst_7 = arith.constant dense<0.000000e+00> : vector<128xf32>
    %15 = vector.multi_reduction <add>, %13, %cst_7 [0] : vector<2x128xf32> to vector<128xf32>
    %16 = vector.shape_cast %15 : vector<128xf32> to vector<1x128xf32>
    %c0_8 = arith.constant 0 : index
    %c0_9 = arith.constant 0 : index
    %17 = vector.load %arg4[%c0_8, %c0_9] : memref<1x128xf32, #tpu.memory_space<vmem>>, vector<1x128xf32>
    tpu.vector_store %arg4[%c0_8, %c0_9], %16 {strides = array<i32>} : memref<1x128xf32, #tpu.memory_space<vmem>>, vector<1x128xf32>,
    return
  }
  func.func @transform_0(%arg0: i32) -> (i32, i32) {
    %c0_i32 = arith.constant 0 : i32
    %c0_i32_0 = arith.constant 0 : i32
    return %arg0, %c0_i32 : i32, i32
  }
  func.func @transform_1(%arg0: i32) -> (i32, i32) {
    %c0_i32 = arith.constant 0 : i32
    %c0_i32_0 = arith.constant 0 : i32
    return %arg0, %c0_i32 : i32, i32
  }
  func.func @transform_2(%arg0: i32) -> (i32, i32) {
    %c0_i32 = arith.constant 0 : i32
    %c0_i32_0 = arith.constant 0 : i32
    return %arg0, %c0_i32 : i32, i32
  }
  func.func @transform_3(%arg0: i32) -> (i32, i32) {
    %c0_i32 = arith.constant 0 : i32
    %c0_i32_0 = arith.constant 0 : i32
    return %arg0, %c0_i32 : i32, i32
  }
}

</mosaic_0001>

<bundles_post_ra>
// kernel: tpu_custom_call.1
= control target key start
LH: loop header
LB: loop body
LE: loop exit
PB: predicated region body
PF: predicated region fallthrough
CT: control target
= control target key end

     0   :  { %9 = vsyncpa [#allocation3], 0  ;;  %s220_s0 = inlined_call_operand.hbm [shape: f32[2,128], index: 0, kind: input, shape index: {}]   ;;  %s221_s1 = inlined_call_operand.vmem [shape: f32[2,128], index: 1, kind: input, shape index: {}]   ;;  %s222_s2 = inlined_call_operand.hbm [shape: f32[2,128], index: 2, kind: output, shape index: {0}]   ;;  %s223_s3 = inlined_call_operand.hbm [shape: f32[1,128], index: 3, kind: output, shape index: {1}]  }
   0x1   :  { %10 = vsyncpa [#allocation4], 0 }
   0x2   :  { %11 = vsyncpa [#allocation7], 0  ;;  %s158_s12 = smov [#allocation2]   ;;  %s86_s16 = scalar_lea.hbm %s220_s0, 32 }
   0x3   :  { %s18_s13 = sshll.u32 %s158_s12, 4  ;;  %p87_p0 = scmp.ne.s32.totalorder %s220_s0, %s86_s16  ;;  %s19_s13 = int_to_ptr.vmem [resolvable:$true] %s18_s13 }
   0x4   :  { %p90_p1 = scmp.lt.u32.totalorder %s86_s16, %s220_s0 }
   0x6   :  { %p92_p2 = pnand %p90_p1, %p87_p0 }
   0x8   :  { %95 = shalt.err (!%p92_p2)
}
   0x9   :  { %s96_s21 = scalar_lea.vmem %s19_s13, 32  ;;  %p101_p4 = scmp.lt.s32.totalorder %s19_s13, %s19_s13 }
   0xa   :  { %p97_p3 = scmp.ne.s32.totalorder %s19_s13, %s96_s21  ;;  %p102_p5 = scmp.lt.s32.totalorder %s96_s21, %s96_s21 }
   0xc   :  { %p103_p6 = por %p102_p5, %p101_p4 }
   0xe   :  { %p104_p7 = pnand %p103_p6, %p97_p3 }
  0x10   :  { %107 = shalt.err (!%p104_p7)
}
  0x11   :  { %21 = dma.hbm_to_vmem [thread:$0]  %s220_s0, 32, %s19_s13, [#allocation3]  }
  0x12   :  { %152 = dma.done.wait [#allocation3], 32  }
  0x13   :  { %153 = vsyncadd [#allocation3], 4294967264  ;;  %v27_v0 = vld [vmem:[#allocation2] sm:$0x3]  ;;  %s159_s26 = smov [#allocation5]   ;;  %vm41_vm0 = vcmask 1041408  }
  0x14   :  { %v29_v1 = vand.u32 2147483647, %v27_v0  ;;  %v28_v6 = vld [vmem:[%s221_s1] sm:$0x3]  ;;  %v33_v7 = vmax.f32 %v27_v0, 0.0  ;;  %s56_s0 = sshll.u32 %s159_s26, 4  ;;  %s57_s0 = int_to_ptr.vmem [resolvable:$true] %s56_s0 }
  0x15   :  { %v34_v8 = vmul.f32 %v28_v6, %v27_v0  ;;  %s108_s27 = scalar_lea.vmem %s57_s0, 32  ;;  %p113_p9 = scmp.lt.s32.totalorder %s57_s0, %s57_s0 }
  0x16   :  { %v30_v2 = vsub.f32 0.0, %v29_v1  ;;  %p109_p8 = scmp.ne.s32.totalorder %s57_s0, %s108_s27  ;;  %p114_p10 = scmp.lt.s32.totalorder %s108_s27, %s108_s27 }
  0x17   :  { %v35_v9 = vsub.f32 %v33_v7, %v34_v8 }
  0x18   :  { %v31_v3 = vmul.f32 1.442695, %v30_v2  ;;  %p115_p11 = por %p114_p10, %p113_p9 }
  0x1a   :  { %82 = vpow2.f32 %v31_v3  ;;  %p116_p12 = pnand %p115_p11, %p109_p8 }
  0x24   :  { %v83_v4 = vpop.eup %82 }
  0x25   :  { %v36_v5 = vadd.f32 1.0, %v83_v4 }
  0x27   :  { %84 = vlog2.f32 %v36_v5 }
  0x31   :  { %v85_v10 = vpop.eup %84 }
  0x32   :  { %v38_v11 = vmul.f32 0.6931472, %v85_v10 }
  0x34   :  { %v39_v12 = vadd.f32 %v38_v11, %v35_v9 }
  0x36   :  { %40 = vst [vmem:[#allocation5] sm:$0x3] %v39_v12  ;;  %v42_v13 = vsel %vm41_vm0, %v39_v12, 0.0 }
  0x37   :  { %v43_v14 = vrot.slane %v42_v13, 4 }
  0x38   :  { %119 = shalt.err (!%p116_p12)
}
  0x39   :  { %s120_s29 = scalar_lea.hbm %s222_s2, 32 }
  0x3a   :  { %p121_p13 = scmp.ne.s32.totalorder %s222_s2, %s120_s29  ;;  %p124_p0 = scmp.lt.u32.totalorder %s120_s29, %s222_s2 }
  0x3c   :  { %p126_p1 = pnand %p124_p0, %p121_p13 }
  0x3e   :  { %129 = shalt.err (!%p126_p1)
}
  0x3f   :  { %59 = dma.vmem_to_hbm [thread:$0]  %s57_s0, 32, %s222_s2, [#allocation4]   ;;  %v44_v15 = vadd.f32 %v43_v14, %v42_v13 }
  0x40   :  { %s160_s9 = smov [#allocation6]  }
  0x41   :  { %v45_v16 = vrot.slane %v44_v15, 2  ;;  %s66_s10 = sshll.u32 %s160_s9, 4  ;;  %s67_s10 = int_to_ptr.vmem [resolvable:$true] %s66_s10 }
  0x42   :  { %s130_s11 = scalar_lea.vmem %s67_s10, 16  ;;  %s134_s12 = scalar_lea.vmem %s67_s10, 32 }
  0x43   :  { %v46_v17 = vadd.f32 %v45_v16, %v44_v15  ;;  %p131_p2 = scmp.ne.s32.totalorder %s67_s10, %s130_s11  ;;  %p135_p3 = scmp.lt.s32.totalorder %s67_s10, %s67_s10 }
  0x44   :  { %p136_p4 = scmp.lt.s32.totalorder %s134_s12, %s130_s11 }
  0x45   :  { %v47_v18 = vrot.slane %v46_v17, 1 }
  0x46   :  { %p137_p5 = por %p136_p4, %p135_p3 }
  0x47   :  { %v48_v19 = vadd.f32 %v47_v18, %v46_v17 }
  0x48   :  { %p138_p6 = pnand %p137_p5, %p131_p2 }
  0x49   :  { %49 = vst [vmem:[#allocation6] sm:$0x1] %v48_v19 }
  0x4a   :  { %141 = shalt.err (!%p138_p6)
}
  0x4b   :  { %s142_s2 = scalar_lea.hbm %s223_s3, 16 }
  0x4c   :  { %p143_p7 = scmp.ne.s32.totalorder %s223_s3, %s142_s2  ;;  %p146_p8 = scmp.lt.u32.totalorder %s142_s2, %s223_s3 }
  0x4e   :  { %p148_p9 = pnand %p146_p8, %p143_p7 }
  0x50   :  { %151 = shalt.err (!%p148_p9)
}
  0x51   :  { %69 = dma.vmem_to_hbm [thread:$0]  %s67_s10, 16, %s223_s3, [#allocation7]  }
  0x52   :  { %154 = dma.done.wait [#allocation4], 32  }
  0x53   :  { %155 = vsyncadd [#allocation4], 4294967264 }
  0x54   :  { %156 = dma.done.wait [#allocation7], 16  }
  0x55   :  { %157 = vsyncadd [#allocation7], 4294967280 }
  0x56   :  { %76 = vsyncpa [#allocation3], 1 }
  0x57   :  { %77 = vsyncpa [#allocation4], 1 }
  0x58   :  { %78 = vsyncpa [#allocation7], 1 }

</bundles_post_ra>
